<compile_context>
chip_gen: v5e
topology: v5e:2x2
jax: 0.10.0
libtpu: 0.0.40
codegen_flags: <defaults>
</compile_context>

<pallas_src>
import functools
import math

import jax
import jax.numpy as jnp
from jax.experimental import pallas as pl
from jax.experimental.pallas import tpu as pltpu


def _mha_kernel(valid_ref, q_ref, k_ref, v_ref,
                wq_ref, wk_ref, wv_ref, wo_ref,
                o_ref, ctx_ref,
                *, num_heads, head_dim, block_b, sq, sk):
    """Fused multi-head attention for a block of `block_b` batch elements.

    valid_ref : SMEM (B,) int32               per-batch valid key length
    q_ref     : VMEM (block_b*Sq, Dq)         batch folded into rows
    k_ref     : VMEM (block_b*Sk, Dk)
    v_ref     : VMEM (block_b*Sk, Dv)
    w*_ref    : VMEM (D_in, D)                resident across the grid
    o_ref     : VMEM (block_b*Sq, D)          lane-dense 2-D output slab
    ctx_ref   : VMEM (block_b*Sq, D) scratch  concatenated head outputs
    """
    b0 = pl.program_id(0) * block_b
    inv_sqrt_d = 1.0 / math.sqrt(head_dim)

    # Input projections: batch folded into the matmul row dim, native-dtype
    # operands on the MXU, f32 accumulation.  Scale hoisted onto Q once.
    qp = jnp.dot(q_ref[...], wq_ref[...],
                 preferred_element_type=jnp.float32) * inv_sqrt_d
    kp = jnp.dot(k_ref[...], wk_ref[...], preferred_element_type=jnp.float32)
    vp = jnp.dot(v_ref[...], wv_ref[...],
                 preferred_element_type=jnp.float32).astype(v_ref.dtype)

    col = jax.lax.broadcasted_iota(jnp.int32, (sq, sk), 1)

    for bb in range(block_b):                     # static: block_b is small
        vlen = valid_ref[b0 + bb]
        # Additive key-position mask bias, shared by every head of this batch
        # element.  (Matches d2l's fill value -1e6; for the degenerate vlen=0
        # case d2l yields a uniform softmax -- not exercised here.)
        bias = jnp.where(col < vlen, 0.0, -1e6).astype(jnp.float32)  # (Sq, Sk)
        rq, rk = bb * sq, bb * sk
        for h in range(num_heads):                # static: num_heads is small
            lo = h * head_dim
            qh = qp[rq:rq + sq, lo:lo + head_dim]         # (Sq, dh) f32
            kh = kp[rk:rk + sk, lo:lo + head_dim]         # (Sk, dh) f32
            vh = vp[rk:rk + sk, lo:lo + head_dim]         # (Sk, dh) native

            # scores (already scaled via qp) + mask bias
            s = jax.lax.dot_general(
                qh, kh, (((1,), (1,)), ((), ())),
                preferred_element_type=jnp.float32) + bias           # (Sq, Sk)
            s = s - jnp.max(s, axis=-1, keepdims=True)
            p = jnp.exp(s)
            p = p * pl.reciprocal(jnp.sum(p, axis=-1, keepdims=True),
                                  approx=True)
            oh = jnp.dot(p.astype(vh.dtype), vh,
                         preferred_element_type=jnp.float32)          # (Sq, dh)
            ctx_ref[rq:rq + sq, lo:lo + head_dim] = oh.astype(ctx_ref.dtype)

    # Single full-contraction output projection (replaces per-head W_o fold).
    o_ref[...] = jnp.dot(ctx_ref[...], wo_ref[...],
                         preferred_element_type=jnp.float32).astype(o_ref.dtype)


def _pick_block_b(batch, sq, sk, max_rows=256):
    """Largest divisor of `batch` whose folded row block stays modest and
    keeps the row block (8,128)-tileable (or full-extent)."""
    best = 1
    for cand in range(1, batch + 1):
        if batch % cand:
            continue
        if cand * max(sq, sk) > max_rows:
            continue
        rows_ok = (cand == batch) or (cand * sq % 8 == 0 and cand * sk % 8 == 0)
        if rows_ok:
            best = cand
    return best


def multi_head_attention(q, k, v, wq, wk, wv, wo, valid_lens, num_heads,
                         block_b=None):
    """JAX/Pallas equivalent of MultiHeadAttention.forward (bias=False, eval)."""
    B, Sq, Dq = q.shape
    _, Sk, Dk = k.shape
    Dv = v.shape[2]
    D = wq.shape[1]
    head_dim = D // num_heads

    if valid_lens is None:
        valid_lens = jnp.full((B,), Sk, dtype=jnp.int32)
    valid_lens = valid_lens.astype(jnp.int32)

    if block_b is None:
        block_b = _pick_block_b(B, Sq, Sk)
    assert B % block_b == 0, (B, block_b)

    # Fold batch into the row dim: lane-dense 2-D operand / output slabs.
    q2 = q.reshape(B * Sq, Dq)
    k2 = k.reshape(B * Sk, Dk)
    v2 = v.reshape(B * Sk, Dv)

    kernel = functools.partial(_mha_kernel, num_heads=num_heads,
                               head_dim=head_dim, block_b=block_b,
                               sq=Sq, sk=Sk)

    row_map = lambda i, vl: (i, 0)      # per-batch-block activation rows
    const_map = lambda i, vl: (0, 0)    # weights resident across the grid

    out2 = pl.pallas_call(
        kernel,
        out_shape=jax.ShapeDtypeStruct((B * Sq, D), q.dtype),
        grid_spec=pltpu.PrefetchScalarGridSpec(
            num_scalar_prefetch=1,
            grid=(B // block_b,),
            in_specs=[
                pl.BlockSpec((block_b * Sq, Dq), row_map),
                pl.BlockSpec((block_b * Sk, Dk), row_map),
                pl.BlockSpec((block_b * Sk, Dv), row_map),
                pl.BlockSpec(wq.shape, const_map),
                pl.BlockSpec(wk.shape, const_map),
                pl.BlockSpec(wv.shape, const_map),
                pl.BlockSpec(wo.shape, const_map),
            ],
            out_specs=pl.BlockSpec((block_b * Sq, D), row_map),
            scratch_shapes=[pltpu.VMEM((block_b * Sq, D), q.dtype)],
        ),
        compiler_params=pltpu.CompilerParams(
            dimension_semantics=("parallel",),
            vmem_limit_bytes=32 * 1024 * 1024,
        ),
    )(valid_lens, q2, k2, v2, wq, wk, wv, wo)

    return out2.reshape(B, Sq, D)


def _reference(q, k, v, wq, wk, wv, wo, valid_lens, num_heads):
    """Pure-JAX reference mirroring the PyTorch module (high-precision matmuls)."""
    hp = jax.lax.Precision.HIGHEST

    def tqkv(x):
        b, s, _ = x.shape
        x = x.reshape(b, s, num_heads, -1).transpose(0, 2, 1, 3)
        return x.reshape(b * num_heads, s, x.shape[-1])

    qh = tqkv(jnp.dot(q, wq, precision=hp))
    kh = tqkv(jnp.dot(k, wk, precision=hp))
    vh = tqkv(jnp.dot(v, wv, precision=hp))
    d = qh.shape[-1]
    scores = jnp.einsum('bqd,bkd->bqk', qh, kh, precision=hp) / math.sqrt(d)
    if valid_lens is not None:
        vl = jnp.repeat(valid_lens, num_heads)
        mask = jnp.arange(scores.shape[-1])[None, None, :] < vl[:, None, None]
        scores = jnp.where(mask, scores, -1e6)
    attn = jax.nn.softmax(scores, axis=-1)
    out = jnp.einsum('bqk,bkd->bqd', attn, vh, precision=hp)
    b = q.shape[0]
    out = out.reshape(b, num_heads, out.shape[1], -1).transpose(0, 2, 1, 3)
    out = out.reshape(b, out.shape[1], -1)
    return jnp.dot(out, wo, precision=hp)


if __name__ == "__main__":
    key = jax.random.PRNGKey(0)
    keys = jax.random.split(key, 8)

    # Small shapes consistent with the module: batch=2, seq=8, num_hiddens=32,
    # num_heads=4 (head_dim=8); key_size=query_size=value_size=num_hiddens.
    B, Sq, Sk = 2, 8, 8
    D = 32
    H = 4

    scale = 1.0 / math.sqrt(D)
    q = jax.random.normal(keys[0], (B, Sq, D), jnp.float32)
    k = jax.random.normal(keys[1], (B, Sk, D), jnp.float32)
    v = jax.random.normal(keys[2], (B, Sk, D), jnp.float32)
    wq = jax.random.normal(keys[3], (D, D), jnp.float32) * scale
    wk = jax.random.normal(keys[4], (D, D), jnp.float32) * scale
    wv = jax.random.normal(keys[5], (D, D), jnp.float32) * scale
    wo = jax.random.normal(keys[6], (D, D), jnp.float32) * scale
    valid_lens = jnp.array([3, 6], dtype=jnp.int32)

    out = multi_head_attention(q, k, v, wq, wk, wv, wo, valid_lens, num_heads=H)
    out = jax.block_until_ready(out)

    ref = _reference(q, k, v, wq, wk, wv, wo, valid_lens, H)
    assert out.shape == (B, Sq, D), out.shape
    max_err = float(jnp.max(jnp.abs(out - ref)))
    # Tolerance accommodates the EUP approximate reciprocal in the softmax.
    assert jnp.allclose(out, ref, rtol=5e-3, atol=5e-3), max_err

    print("KERNEL_OK")
</pallas_src>

<mosaic_0001>
module attributes {stable_mosaic.version = 11 : i64} {
  func.func @_mha_kernel(%arg0: i32, %arg1: memref<2xi32, #tpu.memory_space<smem>>, %arg2: memref<16x32xf32, #tpu.memory_space<vmem>>, %arg3: memref<16x32xf32, #tpu.memory_space<vmem>>, %arg4: memref<16x32xf32, #tpu.memory_space<vmem>>, %arg5: memref<32x32xf32, #tpu.memory_space<vmem>>, %arg6: memref<32x32xf32, #tpu.memory_space<vmem>>, %arg7: memref<32x32xf32, #tpu.memory_space<vmem>>, %arg8: memref<32x32xf32, #tpu.memory_space<vmem>>, %arg9: memref<16x32xf32, #tpu.memory_space<vmem>>, %arg10: memref<16x32xf32, #tpu.memory_space<vmem>>) attributes {dimension_semantics = [#tpu.dimension_semantics<parallel>], iteration_bounds = array<i64: 1>, scalar_prefetch = 1 : i64, scratch_operands = 1 : i64, tpu.core_type = #tpu.core_type<tc>, window_params = [{transform_indices = @transform_0, window_bounds = array<i64: 16, 32>}, {transform_indices = @transform_1, window_bounds = array<i64: 16, 32>}, {transform_indices = @transform_2, window_bounds = array<i64: 16, 32>}, {pipeline_mode = #tpu.pipeline_mode<synchronous>, transform_indices = @transform_3, window_bounds = array<i64: 32, 32>}, {pipeline_mode = #tpu.pipeline_mode<synchronous>, transform_indices = @transform_4, window_bounds = array<i64: 32, 32>}, {pipeline_mode = #tpu.pipeline_mode<synchronous>, transform_indices = @transform_5, window_bounds = array<i64: 32, 32>}, {pipeline_mode = #tpu.pipeline_mode<synchronous>, transform_indices = @transform_6, window_bounds = array<i64: 32, 32>}, {transform_indices = @transform_7, window_bounds = array<i64: 16, 32>}]} {
    %c2_i32 = arith.constant 2 : i32
    %0 = arith.muli %arg0, %c2_i32 : i32
    %c0 = arith.constant 0 : index
    %c0_0 = arith.constant 0 : index
    %1 = vector.load %arg2[%c0, %c0_0] : memref<16x32xf32, #tpu.memory_space<vmem>>, vector<16x32xf32>
    %c0_1 = arith.constant 0 : index
    %c0_2 = arith.constant 0 : index
    %2 = vector.load %arg5[%c0_1, %c0_2] : memref<32x32xf32, #tpu.memory_space<vmem>>, vector<32x32xf32>
    %cst = arith.constant dense<0.000000e+00> : vector<16x32xf32>
    %3 = tpu.matmul %1, %2, %cst {dimension_numbers = #tpu.dot_dimension_numbers<[1], [0], [0], [1], [0, 0, 1, 1], [], []>} : vector<16x32xf32>, vector<32x32xf32>, vector<16x32xf32> -> vector<16x32xf32>
    %cst_3 = arith.constant 0.353553385 : f32
    %4 = vector.broadcast %cst_3 : f32 to vector<16x32xf32>
    %5 = arith.mulf %3, %4 : vector<16x32xf32>
    %c0_4 = arith.constant 0 : index
    %c0_5 = arith.constant 0 : index
    %6 = vector.load %arg3[%c0_4, %c0_5] : memref<16x32xf32, #tpu.memory_space<vmem>>, vector<16x32xf32>
    %c0_6 = arith.constant 0 : index
    %c0_7 = arith.constant 0 : index
    %7 = vector.load %arg6[%c0_6, %c0_7] : memref<32x32xf32, #tpu.memory_space<vmem>>, vector<32x32xf32>
    %cst_8 = arith.constant dense<0.000000e+00> : vector<16x32xf32>
    %8 = tpu.matmul %6, %7, %cst_8 {dimension_numbers = #tpu.dot_dimension_numbers<[1], [0], [0], [1], [0, 0, 1, 1], [], []>} : vector<16x32xf32>, vector<32x32xf32>, vector<16x32xf32> -> vector<16x32xf32>
    %c0_9 = arith.constant 0 : index
    %c0_10 = arith.constant 0 : index
    %9 = vector.load %arg4[%c0_9, %c0_10] : memref<16x32xf32, #tpu.memory_space<vmem>>, vector<16x32xf32>
    %c0_11 = arith.constant 0 : index
    %c0_12 = arith.constant 0 : index
    %10 = vector.load %arg7[%c0_11, %c0_12] : memref<32x32xf32, #tpu.memory_space<vmem>>, vector<32x32xf32>
    %cst_13 = arith.constant dense<0.000000e+00> : vector<16x32xf32>
    %11 = tpu.matmul %9, %10, %cst_13 {dimension_numbers = #tpu.dot_dimension_numbers<[1], [0], [0], [1], [0, 0, 1, 1], [], []>} : vector<16x32xf32>, vector<32x32xf32>, vector<16x32xf32> -> vector<16x32xf32>
    %12 = tpu.iota {dimensions = array<i32: 1>} : vector<8x8xi32>
    %c0_i32 = arith.constant 0 : i32
    %13 = arith.addi %0, %c0_i32 : i32
    %14 = arith.index_cast %13 : i32 to index
    %15 = memref.load %arg1[%14] : memref<2xi32, #tpu.memory_space<smem>>
    %16 = vector.broadcast %15 : i32 to vector<8x8xi32>
    %17 = arith.cmpi slt, %12, %16 : vector<8x8xi32>
    %cst_14 = arith.constant 0.000000e+00 : f32
    %cst_15 = arith.constant -1.000000e+06 : f32
    %18 = vector.broadcast %cst_14 : f32 to vector<8x8xf32>
    %19 = vector.broadcast %cst_15 : f32 to vector<8x8xf32>
    %20 = arith.select %17, %18, %19 : vector<8x8xi1>, vector<8x8xf32>
    %21 = vector.extract_strided_slice %5 {offsets = [0, 0], sizes = [8, 8], strides = [1, 1]} : vector<16x32xf32> to vector<8x8xf32>
    %22 = vector.extract_strided_slice %8 {offsets = [0, 0], sizes = [8, 8], strides = [1, 1]} : vector<16x32xf32> to vector<8x8xf32>
    %23 = vector.extract_strided_slice %11 {offsets = [0, 0], sizes = [8, 8], strides = [1, 1]} : vector<16x32xf32> to vector<8x8xf32>
    %cst_16 = arith.constant dense<0.000000e+00> : vector<8x8xf32>
    %24 = tpu.matmul %21, %22, %cst_16 {dimension_numbers = #tpu.dot_dimension_numbers<[1], [1], [0], [0], [0, 0, 1, 0], [], []>} : vector<8x8xf32>, vector<8x8xf32>, vector<8x8xf32> -> vector<8x8xf32>
    %25 = arith.addf %24, %20 : vector<8x8xf32>
    %cst_17 = arith.constant dense<0xFF800000> : vector<8xf32>
    %26 = vector.multi_reduction <maximumf>, %25, %cst_17 [1] : vector<8x8xf32> to vector<8xf32>
    %27 = vector.shape_cast %26 : vector<8xf32> to vector<8x1xf32>
    %28 = vector.broadcast %27 : vector<8x1xf32> to vector<8x8xf32>
    %29 = arith.subf %25, %28 : vector<8x8xf32>
    %30 = math.exp %29 : vector<8x8xf32>
    %cst_18 = arith.constant dense<0.000000e+00> : vector<8xf32>
    %31 = vector.multi_reduction <add>, %30, %cst_18 [1] : vector<8x8xf32> to vector<8xf32>
    %32 = vector.shape_cast %31 : vector<8xf32> to vector<8x1xf32>
    %33 = tpu.reciprocal %32 {approx = true} : vector<8x1xf32> -> vector<8x1xf32>
    %34 = vector.broadcast %33 : vector<8x1xf32> to vector<8x8xf32>
    %35 = arith.mulf %30, %34 : vector<8x8xf32>
    %cst_19 = arith.constant dense<0.000000e+00> : vector<8x8xf32>
    %36 = tpu.matmul %35, %23, %cst_19 {dimension_numbers = #tpu.dot_dimension_numbers<[1], [0], [0], [1], [0, 0, 1, 1], [], []>} : vector<8x8xf32>, vector<8x8xf32>, vector<8x8xf32> -> vector<8x8xf32>
    %c0_20 = arith.constant 0 : index
    %c0_21 = arith.constant 0 : index
    %37 = vector.load %arg10[%c0_20, %c0_21] : memref<16x32xf32, #tpu.memory_space<vmem>>, vector<8x8xf32>
    tpu.vector_store %arg10[%c0_20, %c0_21], %36 {strides = array<i32>} : memref<16x32xf32, #tpu.memory_space<vmem>>, vector<8x8xf32>,
    %38 = vector.extract_strided_slice %5 {offsets = [0, 8], sizes = [8, 8], strides = [1, 1]} : vector<16x32xf32> to vector<8x8xf32>
    %39 = vector.extract_strided_slice %8 {offsets = [0, 8], sizes = [8, 8], strides = [1, 1]} : vector<16x32xf32> to vector<8x8xf32>
    %40 = vector.extract_strided_slice %11 {offsets = [0, 8], sizes = [8, 8], strides = [1, 1]} : vector<16x32xf32> to vector<8x8xf32>
    %cst_22 = arith.constant dense<0.000000e+00> : vector<8x8xf32>
    %41 = tpu.matmul %38, %39, %cst_22 {dimension_numbers = #tpu.dot_dimension_numbers<[1], [1], [0], [0], [0, 0, 1, 0], [], []>} : vector<8x8xf32>, vector<8x8xf32>, vector<8x8xf32> -> vector<8x8xf32>
    %42 = arith.addf %41, %20 : vector<8x8xf32>
    %cst_23 = arith.constant dense<0xFF800000> : vector<8xf32>
    %43 = vector.multi_reduction <maximumf>, %42, %cst_23 [1] : vector<8x8xf32> to vector<8xf32>
    %44 = vector.shape_cast %43 : vector<8xf32> to vector<8x1xf32>
    %45 = vector.broadcast %44 : vector<8x1xf32> to vector<8x8xf32>
    %46 = arith.subf %42, %45 : vector<8x8xf32>
    %47 = math.exp %46 : vector<8x8xf32>
    %cst_24 = arith.constant dense<0.000000e+00> : vector<8xf32>
    %48 = vector.multi_reduction <add>, %47, %cst_24 [1] : vector<8x8xf32> to vector<8xf32>
    %49 = vector.shape_cast %48 : vector<8xf32> to vector<8x1xf32>
    %50 = tpu.reciprocal %49 {approx = true} : vector<8x1xf32> -> vector<8x1xf32>
    %51 = vector.broadcast %50 : vector<8x1xf32> to vector<8x8xf32>
    %52 = arith.mulf %47, %51 : vector<8x8xf32>
    %cst_25 = arith.constant dense<0.000000e+00> : vector<8x8xf32>
    %53 = tpu.matmul %52, %40, %cst_25 {dimension_numbers = #tpu.dot_dimension_numbers<[1], [0], [0], [1], [0, 0, 1, 1], [], []>} : vector<8x8xf32>, vector<8x8xf32>, vector<8x8xf32> -> vector<8x8xf32>
    %c0_26 = arith.constant 0 : index
    %c8 = arith.constant 8 : index
    %54 = vector.load %arg10[%c0_26, %c8] : memref<16x32xf32, #tpu.memory_space<vmem>>, vector<8x8xf32>
    tpu.vector_store %arg10[%c0_26, %c8], %53 {strides = array<i32>} : memref<16x32xf32, #tpu.memory_space<vmem>>, vector<8x8xf32>,
    %55 = vector.extract_strided_slice %5 {offsets = [0, 16], sizes = [8, 8], strides = [1, 1]} : vector<16x32xf32> to vector<8x8xf32>
    %56 = vector.extract_strided_slice %8 {offsets = [0, 16], sizes = [8, 8], strides = [1, 1]} : vector<16x32xf32> to vector<8x8xf32>
    %57 = vector.extract_strided_slice %11 {offsets = [0, 16], sizes = [8, 8], strides = [1, 1]} : vector<16x32xf32> to vector<8x8xf32>
    %cst_27 = arith.constant dense<0.000000e+00> : vector<8x8xf32>
    %58 = tpu.matmul %55, %56, %cst_27 {dimension_numbers = #tpu.dot_dimension_numbers<[1], [1], [0], [0], [0, 0, 1, 0], [], []>} : vector<8x8xf32>, vector<8x8xf32>, vector<8x8xf32> -> vector<8x8xf32>
    %59 = arith.addf %58, %20 : vector<8x8xf32>
    %cst_28 = arith.constant dense<0xFF800000> : vector<8xf32>
    %60 = vector.multi_reduction <maximumf>, %59, %cst_28 [1] : vector<8x8xf32> to vector<8xf32>
    %61 = vector.shape_cast %60 : vector<8xf32> to vector<8x1xf32>
    %62 = vector.broadcast %61 : vector<8x1xf32> to vector<8x8xf32>
    %63 = arith.subf %59, %62 : vector<8x8xf32>
    %64 = math.exp %63 : vector<8x8xf32>
    %cst_29 = arith.constant dense<0.000000e+00> : vector<8xf32>
    %65 = vector.multi_reduction <add>, %64, %cst_29 [1] : vector<8x8xf32> to vector<8xf32>
    %66 = vector.shape_cast %65 : vector<8xf32> to vector<8x1xf32>
    %67 = tpu.reciprocal %66 {approx = true} : vector<8x1xf32> -> vector<8x1xf32>
    %68 = vector.broadcast %67 : vector<8x1xf32> to vector<8x8xf32>
    %69 = arith.mulf %64, %68 : vector<8x8xf32>
    %cst_30 = arith.constant dense<0.000000e+00> : vector<8x8xf32>
    %70 = tpu.matmul %69, %57, %cst_30 {dimension_numbers = #tpu.dot_dimension_numbers<[1], [0], [0], [1], [0, 0, 1, 1], [], []>} : vector<8x8xf32>, vector<8x8xf32>, vector<8x8xf32> -> vector<8x8xf32>
    %c0_31 = arith.constant 0 : index
    %c16 = arith.constant 16 : index
    %71 = vector.load %arg10[%c0_31, %c16] : memref<16x32xf32, #tpu.memory_space<vmem>>, vector<8x8xf32>
    tpu.vector_store %arg10[%c0_31, %c16], %70 {strides = array<i32>} : memref<16x32xf32, #tpu.memory_space<vmem>>, vector<8x8xf32>,
    %72 = vector.extract_strided_slice %5 {offsets = [0, 24], sizes = [8, 8], strides = [1, 1]} : vector<16x32xf32> to vector<8x8xf32>
    %73 = vector.extract_strided_slice %8 {offsets = [0, 24], sizes = [8, 8], strides = [1, 1]} : vector<16x32xf32> to vector<8x8xf32>
    %74 = vector.extract_strided_slice %11 {offsets = [0, 24], sizes = [8, 8], strides = [1, 1]} : vector<16x32xf32> to vector<8x8xf32>
    %cst_32 = arith.constant dense<0.000000e+00> : vector<8x8xf32>
    %75 = tpu.matmul %72, %73, %cst_32 {dimension_numbers = #tpu.dot_dimension_numbers<[1], [1], [0], [0], [0, 0, 1, 0], [], []>} : vector<8x8xf32>, vector<8x8xf32>, vector<8x8xf32> -> vector<8x8xf32>
    %76 = arith.addf %75, %20 : vector<8x8xf32>
    %cst_33 = arith.constant dense<0xFF800000> : vector<8xf32>
    %77 = vector.multi_reduction <maximumf>, %76, %cst_33 [1] : vector<8x8xf32> to vector<8xf32>
    %78 = vector.shape_cast %77 : vector<8xf32> to vector<8x1xf32>
    %79 = vector.broadcast %78 : vector<8x1xf32> to vector<8x8xf32>
    %80 = arith.subf %76, %79 : vector<8x8xf32>
    %81 = math.exp %80 : vector<8x8xf32>
    %cst_34 = arith.constant dense<0.000000e+00> : vector<8xf32>
    %82 = vector.multi_reduction <add>, %81, %cst_34 [1] : vector<8x8xf32> to vector<8xf32>
    %83 = vector.shape_cast %82 : vector<8xf32> to vector<8x1xf32>
    %84 = tpu.reciprocal %83 {approx = true} : vector<8x1xf32> -> vector<8x1xf32>
    %85 = vector.broadcast %84 : vector<8x1xf32> to vector<8x8xf32>
    %86 = arith.mulf %81, %85 : vector<8x8xf32>
    %cst_35 = arith.constant dense<0.000000e+00> : vector<8x8xf32>
    %87 = tpu.matmul %86, %74, %cst_35 {dimension_numbers = #tpu.dot_dimension_numbers<[1], [0], [0], [1], [0, 0, 1, 1], [], []>} : vector<8x8xf32>, vector<8x8xf32>, vector<8x8xf32> -> vector<8x8xf32>
    %c0_36 = arith.constant 0 : index
    %c24 = arith.constant 24 : index
    %88 = vector.load %arg10[%c0_36, %c24] : memref<16x32xf32, #tpu.memory_space<vmem>>, vector<8x8xf32>
    tpu.vector_store %arg10[%c0_36, %c24], %87 {strides = array<i32>} : memref<16x32xf32, #tpu.memory_space<vmem>>, vector<8x8xf32>,
    %c1_i32 = arith.constant 1 : i32
    %89 = arith.addi %0, %c1_i32 : i32
    %90 = arith.index_cast %89 : i32 to index
    %91 = memref.load %arg1[%90] : memref<2xi32, #tpu.memory_space<smem>>
    %92 = vector.broadcast %91 : i32 to vector<8x8xi32>
    %93 = arith.cmpi slt, %12, %92 : vector<8x8xi32>
    %cst_37 = arith.constant 0.000000e+00 : f32
    %cst_38 = arith.constant -1.000000e+06 : f32
    %94 = vector.broadcast %cst_37 : f32 to vector<8x8xf32>
    %95 = vector.broadcast %cst_38 : f32 to vector<8x8xf32>
    %96 = arith.select %93, %94, %95 : vector<8x8xi1>, vector<8x8xf32>
    %97 = vector.extract_strided_slice %5 {offsets = [8, 0], sizes = [8, 8], strides = [1, 1]} : vector<16x32xf32> to vector<8x8xf32>
    %98 = vector.extract_strided_slice %8 {offsets = [8, 0], sizes = [8, 8], strides = [1, 1]} : vector<16x32xf32> to vector<8x8xf32>
    %99 = vector.extract_strided_slice %11 {offsets = [8, 0], sizes = [8, 8], strides = [1, 1]} : vector<16x32xf32> to vector<8x8xf32>
    %cst_39 = arith.constant dense<0.000000e+00> : vector<8x8xf32>
    %100 = tpu.matmul %97, %98, %cst_39 {dimension_numbers = #tpu.dot_dimension_numbers<[1], [1], [0], [0], [0, 0, 1, 0], [], []>} : vector<8x8xf32>, vector<8x8xf32>, vector<8x8xf32> -> vector<8x8xf32>
    %101 = arith.addf %100, %96 : vector<8x8xf32>
    %cst_40 = arith.constant dense<0xFF800000> : vector<8xf32>
    %102 = vector.multi_reduction <maximumf>, %101, %cst_40 [1] : vector<8x8xf32> to vector<8xf32>
    %103 = vector.shape_cast %102 : vector<8xf32> to vector<8x1xf32>
    %104 = vector.broadcast %103 : vector<8x1xf32> to vector<8x8xf32>
    %105 = arith.subf %101, %104 : vector<8x8xf32>
    %106 = math.exp %105 : vector<8x8xf32>
    %cst_41 = arith.constant dense<0.000000e+00> : vector<8xf32>
    %107 = vector.multi_reduction <add>, %106, %cst_41 [1] : vector<8x8xf32> to vector<8xf32>
    %108 = vector.shape_cast %107 : vector<8xf32> to vector<8x1xf32>
    %109 = tpu.reciprocal %108 {approx = true} : vector<8x1xf32> -> vector<8x1xf32>
    %110 = vector.broadcast %109 : vector<8x1xf32> to vector<8x8xf32>
    %111 = arith.mulf %106, %110 : vector<8x8xf32>
    %cst_42 = arith.constant dense<0.000000e+00> : vector<8x8xf32>
    %112 = tpu.matmul %111, %99, %cst_42 {dimension_numbers = #tpu.dot_dimension_numbers<[1], [0], [0], [1], [0, 0, 1, 1], [], []>} : vector<8x8xf32>, vector<8x8xf32>, vector<8x8xf32> -> vector<8x8xf32>
    %c8_43 = arith.constant 8 : index
    %c0_44 = arith.constant 0 : index
    %113 = vector.load %arg10[%c8_43, %c0_44] : memref<16x32xf32, #tpu.memory_space<vmem>>, vector<8x8xf32>
    tpu.vector_store %arg10[%c8_43, %c0_44], %112 {strides = array<i32>} : memref<16x32xf32, #tpu.memory_space<vmem>>, vector<8x8xf32>,
    %114 = vector.extract_strided_slice %5 {offsets = [8, 8], sizes = [8, 8], strides = [1, 1]} : vector<16x32xf32> to vector<8x8xf32>
    %115 = vector.extract_strided_slice %8 {offsets = [8, 8], sizes = [8, 8], strides = [1, 1]} : vector<16x32xf32> to vector<8x8xf32>
    %116 = vector.extract_strided_slice %11 {offsets = [8, 8], sizes = [8, 8], strides = [1, 1]} : vector<16x32xf32> to vector<8x8xf32>
    %cst_45 = arith.constant dense<0.000000e+00> : vector<8x8xf32>
    %117 = tpu.matmul %114, %115, %cst_45 {dimension_numbers = #tpu.dot_dimension_numbers<[1], [1], [0], [0], [0, 0, 1, 0], [], []>} : vector<8x8xf32>, vector<8x8xf32>, vector<8x8xf32> -> vector<8x8xf32>
    %118 = arith.addf %117, %96 : vector<8x8xf32>
    %cst_46 = arith.constant dense<0xFF800000> : vector<8xf32>
    %119 = vector.multi_reduction <maximumf>, %118, %cst_46 [1] : vector<8x8xf32> to vector<8xf32>
    %120 = vector.shape_cast %119 : vector<8xf32> to vector<8x1xf32>
    %121 = vector.broadcast %120 : vector<8x1xf32> to vector<8x8xf32>
    %122 = arith.subf %118, %121 : vector<8x8xf32>
    %123 = math.exp %122 : vector<8x8xf32>
    %cst_47 = arith.constant dense<0.000000e+00> : vector<8xf32>
    %124 = vector.multi_reduction <add>, %123, %cst_47 [1] : vector<8x8xf32> to vector<8xf32>
    %125 = vector.shape_cast %124 : vector<8xf32> to vector<8x1xf32>
    %126 = tpu.reciprocal %125 {approx = true} : vector<8x1xf32> -> vector<8x1xf32>
    %127 = vector.broadcast %126 : vector<8x1xf32> to vector<8x8xf32>
    %128 = arith.mulf %123, %127 : vector<8x8xf32>
    %cst_48 = arith.constant dense<0.000000e+00> : vector<8x8xf32>
    %129 = tpu.matmul %128, %116, %cst_48 {dimension_numbers = #tpu.dot_dimension_numbers<[1], [0], [0], [1], [0, 0, 1, 1], [], []>} : vector<8x8xf32>, vector<8x8xf32>, vector<8x8xf32> -> vector<8x8xf32>
    %c8_49 = arith.constant 8 : index
    %c8_50 = arith.constant 8 : index
    %130 = vector.load %arg10[%c8_49, %c8_50] : memref<16x32xf32, #tpu.memory_space<vmem>>, vector<8x8xf32>
    tpu.vector_store %arg10[%c8_49, %c8_50], %129 {strides = array<i32>} : memref<16x32xf32, #tpu.memory_space<vmem>>, vector<8x8xf32>,
    %131 = vector.extract_strided_slice %5 {offsets = [8, 16], sizes = [8, 8], strides = [1, 1]} : vector<16x32xf32> to vector<8x8xf32>
    %132 = vector.extract_strided_slice %8 {offsets = [8, 16], sizes = [8, 8], strides = [1, 1]} : vector<16x32xf32> to vector<8x8xf32>
    %133 = vector.extract_strided_slice %11 {offsets = [8, 16], sizes = [8, 8], strides = [1, 1]} : vector<16x32xf32> to vector<8x8xf32>
    %cst_51 = arith.constant dense<0.000000e+00> : vector<8x8xf32>
    %134 = tpu.matmul %131, %132, %cst_51 {dimension_numbers = #tpu.dot_dimension_numbers<[1], [1], [0], [0], [0, 0, 1, 0], [], []>} : vector<8x8xf32>, vector<8x8xf32>, vector<8x8xf32> -> vector<8x8xf32>
    %135 = arith.addf %134, %96 : vector<8x8xf32>
    %cst_52 = arith.constant dense<0xFF800000> : vector<8xf32>
    %136 = vector.multi_reduction <maximumf>, %135, %cst_52 [1] : vector<8x8xf32> to vector<8xf32>
    %137 = vector.shape_cast %136 : vector<8xf32> to vector<8x1xf32>
    %138 = vector.broadcast %137 : vector<8x1xf32> to vector<8x8xf32>
    %139 = arith.subf %135, %138 : vector<8x8xf32>
    %140 = math.exp %139 : vector<8x8xf32>
    %cst_53 = arith.constant dense<0.000000e+00> : vector<8xf32>
    %141 = vector.multi_reduction <add>, %140, %cst_53 [1] : vector<8x8xf32> to vector<8xf32>
    %142 = vector.shape_cast %141 : vector<8xf32> to vector<8x1xf32>
    %143 = tpu.reciprocal %142 {approx = true} : vector<8x1xf32> -> vector<8x1xf32>
    %144 = vector.broadcast %143 : vector<8x1xf32> to vector<8x8xf32>
    %145 = arith.mulf %140, %144 : vector<8x8xf32>
    %cst_54 = arith.constant dense<0.000000e+00> : vector<8x8xf32>
    %146 = tpu.matmul %145, %133, %cst_54 {dimension_numbers = #tpu.dot_dimension_numbers<[1], [0], [0], [1], [0, 0, 1, 1], [], []>} : vector<8x8xf32>, vector<8x8xf32>, vector<8x8xf32> -> vector<8x8xf32>
    %c8_55 = arith.constant 8 : index
    %c16_56 = arith.constant 16 : index
    %147 = vector.load %arg10[%c8_55, %c16_56] : memref<16x32xf32, #tpu.memory_space<vmem>>, vector<8x8xf32>
    tpu.vector_store %arg10[%c8_55, %c16_56], %146 {strides = array<i32>} : memref<16x32xf32, #tpu.memory_space<vmem>>, vector<8x8xf32>,
    %148 = vector.extract_strided_slice %5 {offsets = [8, 24], sizes = [8, 8], strides = [1, 1]} : vector<16x32xf32> to vector<8x8xf32>
    %149 = vector.extract_strided_slice %8 {offsets = [8, 24], sizes = [8, 8], strides = [1, 1]} : vector<16x32xf32> to vector<8x8xf32>
    %150 = vector.extract_strided_slice %11 {offsets = [8, 24], sizes = [8, 8], strides = [1, 1]} : vector<16x32xf32> to vector<8x8xf32>
    %cst_57 = arith.constant dense<0.000000e+00> : vector<8x8xf32>
    %151 = tpu.matmul %148, %149, %cst_57 {dimension_numbers = #tpu.dot_dimension_numbers<[1], [1], [0], [0], [0, 0, 1, 0], [], []>} : vector<8x8xf32>, vector<8x8xf32>, vector<8x8xf32> -> vector<8x8xf32>
    %152 = arith.addf %151, %96 : vector<8x8xf32>
    %cst_58 = arith.constant dense<0xFF800000> : vector<8xf32>
    %153 = vector.multi_reduction <maximumf>, %152, %cst_58 [1] : vector<8x8xf32> to vector<8xf32>
    %154 = vector.shape_cast %153 : vector<8xf32> to vector<8x1xf32>
    %155 = vector.broadcast %154 : vector<8x1xf32> to vector<8x8xf32>
    %156 = arith.subf %152, %155 : vector<8x8xf32>
    %157 = math.exp %156 : vector<8x8xf32>
    %cst_59 = arith.constant dense<0.000000e+00> : vector<8xf32>
    %158 = vector.multi_reduction <add>, %157, %cst_59 [1] : vector<8x8xf32> to vector<8xf32>
    %159 = vector.shape_cast %158 : vector<8xf32> to vector<8x1xf32>
    %160 = tpu.reciprocal %159 {approx = true} : vector<8x1xf32> -> vector<8x1xf32>
    %161 = vector.broadcast %160 : vector<8x1xf32> to vector<8x8xf32>
    %162 = arith.mulf %157, %161 : vector<8x8xf32>
    %cst_60 = arith.constant dense<0.000000e+00> : vector<8x8xf32>
    %163 = tpu.matmul %162, %150, %cst_60 {dimension_numbers = #tpu.dot_dimension_numbers<[1], [0], [0], [1], [0, 0, 1, 1], [], []>} : vector<8x8xf32>, vector<8x8xf32>, vector<8x8xf32> -> vector<8x8xf32>
    %c8_61 = arith.constant 8 : index
    %c24_62 = arith.constant 24 : index
    %164 = vector.load %arg10[%c8_61, %c24_62] : memref<16x32xf32, #tpu.memory_space<vmem>>, vector<8x8xf32>
    tpu.vector_store %arg10[%c8_61, %c24_62], %163 {strides = array<i32>} : memref<16x32xf32, #tpu.memory_space<vmem>>, vector<8x8xf32>,
    %c0_63 = arith.constant 0 : index
    %c0_64 = arith.constant 0 : index
    %165 = vector.load %arg10[%c0_63, %c0_64] : memref<16x32xf32, #tpu.memory_space<vmem>>, vector<16x32xf32>
    %c0_65 = arith.constant 0 : index
    %c0_66 = arith.constant 0 : index
    %166 = vector.load %arg8[%c0_65, %c0_66] : memref<32x32xf32, #tpu.memory_space<vmem>>, vector<32x32xf32>
    %cst_67 = arith.constant dense<0.000000e+00> : vector<16x32xf32>
    %167 = tpu.matmul %165, %166, %cst_67 {dimension_numbers = #tpu.dot_dimension_numbers<[1], [0], [0], [1], [0, 0, 1, 1], [], []>} : vector<16x32xf32>, vector<32x32xf32>, vector<16x32xf32> -> vector<16x32xf32>
    %c0_68 = arith.constant 0 : index
    %c0_69 = arith.constant 0 : index
    %168 = vector.load %arg9[%c0_68, %c0_69] : memref<16x32xf32, #tpu.memory_space<vmem>>, vector<16x32xf32>
    tpu.vector_store %arg9[%c0_68, %c0_69], %167 {strides = array<i32>} : memref<16x32xf32, #tpu.memory_space<vmem>>, vector<16x32xf32>,
    return
  }
  func.func @transform_0(%arg0: i32, %arg1: memref<2xi32, #tpu.memory_space<smem>>) -> (i32, i32) {
    %c0_i32 = arith.constant 0 : i32
    %c0_i32_0 = arith.constant 0 : i32
    return %arg0, %c0_i32 : i32, i32
  }
  func.func @transform_1(%arg0: i32, %arg1: memref<2xi32, #tpu.memory_space<smem>>) -> (i32, i32) {
    %c0_i32 = arith.constant 0 : i32
    %c0_i32_0 = arith.constant 0 : i32
    return %arg0, %c0_i32 : i32, i32
  }
  func.func @transform_2(%arg0: i32, %arg1: memref<2xi32, #tpu.memory_space<smem>>) -> (i32, i32) {
    %c0_i32 = arith.constant 0 : i32
    %c0_i32_0 = arith.constant 0 : i32
    return %arg0, %c0_i32 : i32, i32
  }
  func.func @transform_3(%arg0: i32, %arg1: memref<2xi32, #tpu.memory_space<smem>>) -> (i32, i32) {
    %c0_i32 = arith.constant 0 : i32
    %c0_i32_0 = arith.constant 0 : i32
    %c0_i32_1 = arith.constant 0 : i32
    return %c0_i32, %c0_i32_0 : i32, i32
  }
  func.func @transform_4(%arg0: i32, %arg1: memref<2xi32, #tpu.memory_space<smem>>) -> (i32, i32) {
    %c0_i32 = arith.constant 0 : i32
    %c0_i32_0 = arith.constant 0 : i32
    %c0_i32_1 = arith.constant 0 : i32
    return %c0_i32, %c0_i32_0 : i32, i32
  }
  func.func @transform_5(%arg0: i32, %arg1: memref<2xi32, #tpu.memory_space<smem>>) -> (i32, i32) {
    %c0_i32 = arith.constant 0 : i32
    %c0_i32_0 = arith.constant 0 : i32
    %c0_i32_1 = arith.constant 0 : i32
    return %c0_i32, %c0_i32_0 : i32, i32
  }
  func.func @transform_6(%arg0: i32, %arg1: memref<2xi32, #tpu.memory_space<smem>>) -> (i32, i32) {
    %c0_i32 = arith.constant 0 : i32
    %c0_i32_0 = arith.constant 0 : i32
    %c0_i32_1 = arith.constant 0 : i32
    return %c0_i32, %c0_i32_0 : i32, i32
  }
  func.func @transform_7(%arg0: i32, %arg1: memref<2xi32, #tpu.memory_space<smem>>) -> (i32, i32) {
    %c0_i32 = arith.constant 0 : i32
    %c0_i32_0 = arith.constant 0 : i32
    return %arg0, %c0_i32 : i32, i32
  }
}

</mosaic_0001>

<bundles_post_ra>
// kernel: tpu_custom_call.1
= control target key start
LH: loop header
LB: loop body
LE: loop exit
PB: predicated region body
PF: predicated region fallthrough
CT: control target
= control target key end

     0   :  { %s1174_s30 = smov [#allocation4]   ;;  %s1383_s0 = inlined_call_operand.hbm [shape: s32[2], index: 0, kind: input, shape index: {}]   ;;  %s1384_s1 = inlined_call_operand.hbm [shape: f32[16,32], index: 1, kind: input, shape index: {}]   ;;  %s1385_s2 = inlined_call_operand.hbm [shape: f32[16,32], index: 2, kind: input, shape index: {}]   ;;  %s1386_s3 = inlined_call_operand.hbm [shape: f32[16,32], index: 3, kind: input, shape index: {}]   ;;  %s1387_s4 = inlined_call_operand.hbm [shape: f32[32,32], index: 4, kind: input, shape index: {}]   ;;  %s1388_s5 = inlined_call_operand.hbm [shape: f32[32,32], index: 5, kind: input, shape index: {}]   ;;  %s1389_s6 = inlined_call_operand.hbm [shape: f32[32,32], index: 6, kind: input, shape index: {}]   ;;  %s1390_s7 = inlined_call_operand.hbm [shape: f32[32,32], index: 7, kind: input, shape index: {}]   ;;  %s1391_s8 = inlined_call_operand.hbm [shape: f32[16,32], index: 8, kind: output, shape index: {}]  }
   0x1   :  { %s14_s29 = sshll.u32 %s1383_s0, 4  ;;  %s15_s29 = int_to_ptr.hbm [resolvable:$true] %s14_s29 }
   0x2   :  { %17 = dma.hbm_to_smem %s15_s29, 16, %s1174_s30, [#allocation3] }
   0x3   :  { %1162 = dma.done.wait [#allocation3], 16 }
   0x4   :  { %1163 = vsyncadd [#allocation3], 4294967280 }
   0x5   :  { %20 = sfence }
   0x6   :  { %21 = vsyncpa [#allocation6], 0 }
   0x7   :  { %22 = vsyncpa [#allocation9], 0 }
   0x8   :  { %23 = vsyncpa [#allocation12], 0 }
   0x9   :  { %24 = vsyncpa [#allocation15], 0 }
   0xa   :  { %25 = vsyncpa [#allocation7], 0  ;;  %s43_s11 = sshll.u32 %s1385_s2, 4  ;;  %s1175_s12 = smov [#allocation8]   ;;  %s44_s11 = int_to_ptr.hbm [resolvable:$true] %s43_s11 }
   0xb   :  { %s45_s13 = sshll.u32 %s1175_s12, 4  ;;  %s69_s15 = sshll.u32 %s1387_s4, 4  ;;  %s46_s13 = int_to_ptr.vmem [resolvable:$true] %s45_s13  ;;  %s70_s15 = int_to_ptr.hbm [resolvable:$true] %s69_s15 }
   0xc   :  { %s1176_s16 = smov 128   ;;  %s1177_s17 = smov 8  }
   0xd   :  { %51 = dma.hbm_to_vmem [thread:$0]  %s44_s11, 256, %s46_s13, [#allocation9], %s1176_s16, %s1176_s16, %s1177_s17  }
   0xe   :  { %s1178_s18 = smov [#allocation11]   ;;  %s95_s2 = sshll.u32 %s1389_s6, 4  ;;  %s96_s2 = int_to_ptr.hbm [resolvable:$true] %s95_s2 }
   0xf   :  { %s71_s19 = sshll.u32 %s1178_s18, 4  ;;  %s30_s23 = sshll.u32 %s1384_s1, 4  ;;  %s72_s19 = int_to_ptr.vmem [resolvable:$true] %s71_s19  ;;  %s31_s23 = int_to_ptr.hbm [resolvable:$true] %s30_s23 }
  0x10   :  { %77 = dma.hbm_to_vmem [thread:$0]  %s70_s15, 512, %s72_s19, [#allocation12], %s1176_s16, %s1176_s16, %s1177_s17  }
  0x11   :  { %s1179_s24 = smov [#allocation14]   ;;  %s1180_s26 = smov [#allocation5]  }
  0x12   :  { %s97_s25 = sshll.u32 %s1179_s24, 4  ;;  %s32_s6 = sshll.u32 %s1180_s26, 4  ;;  %s98_s25 = int_to_ptr.vmem [resolvable:$true] %s97_s25  ;;  %s33_s6 = int_to_ptr.vmem [resolvable:$true] %s32_s6 }
  0x13   :  { %103 = dma.hbm_to_vmem [thread:$0]  %s96_s2, 512, %s98_s25, [#allocation15], %s1176_s16, %s1176_s16, %s1177_s17  }
  0x14   :  { %s56_s29 = sshll.u32 %s1386_s3, 4  ;;  %s82_s9 = sshll.u32 %s1388_s5, 4  ;;  %s57_s29 = int_to_ptr.hbm [resolvable:$true] %s56_s29  ;;  %s83_s9 = int_to_ptr.hbm [resolvable:$true] %s82_s9 }
  0x15   :  { %38 = dma.hbm_to_vmem [thread:$0]  %s31_s23, 256, %s33_s6, [#allocation6], %s1176_s16, %s1176_s16, %s1177_s17  }
  0x16   :  { %s1181_s10 = smov [#allocation10]   ;;  %s1182_s12 = smov [#allocation13]  }
  0x17   :  { %s58_s11 = sshll.u32 %s1181_s10, 4  ;;  %s84_s3 = sshll.u32 %s1182_s12, 4  ;;  %s59_s11 = int_to_ptr.vmem [resolvable:$true] %s58_s11  ;;  %s85_s3 = int_to_ptr.vmem [resolvable:$true] %s84_s3 }
  0x18   :  { %64 = dma.hbm_to_vmem [thread:$0]  %s57_s29, 256, %s59_s11, [#allocation9], %s1176_s16, %s1176_s16, %s1177_s17  }
  0x19   :  { %s108_s14 = sshll.u32 %s1390_s7, 4  ;;  %s1183_s5 = smov [#allocation16]   ;;  %s109_s14 = int_to_ptr.hbm [resolvable:$true] %s108_s14 }
  0x1a   :  { %90 = dma.hbm_to_vmem [thread:$0]  %s83_s9, 512, %s85_s3, [#allocation12], %s1176_s16, %s1176_s16, %s1177_s17  }
  0x1b   :  { %s110_s15 = sshll.u32 %s1183_s5, 4  ;;  %s111_s15 = int_to_ptr.vmem [resolvable:$true] %s110_s15 }
  0x1c   :  { %116 = dma.hbm_to_vmem [thread:$0]  %s109_s14, 512, %s111_s15, [#allocation15], %s1176_s16, %s1176_s16, %s1177_s17  }
  0x1d   :  { %1164 = dma.done.wait [#allocation6], 256  }
  0x1e   :  { %1165 = vsyncadd [#allocation6], 4294967040 }
  0x1f   :  { %1166 = dma.done.wait [#allocation9], 512  }
  0x20   :  { %1167 = vsyncadd [#allocation9], 4294966784 }
  0x21   :  { %1168 = dma.done.wait [#allocation12], 1024  }
  0x22   :  { %1169 = vsyncadd [#allocation12], 4294966272 }
  0x23   :  { %1170 = dma.done.wait [#allocation15], 1024  }
  0x24   :  { %1171 = vsyncadd [#allocation15], 4294966272  ;;  %v189_v0 = vld [vmem:[#allocation13 + $0x18] sm:$0xff]  ;;  %v188_v2 = vld [vmem:[#allocation13 + $0x10] sm:$0xff]  ;;  %vm152_vm0 = vcmask 261120   ;;  %vm260_vm1 = vcmask 64512   ;;  %v254_v24 = vlaneseq }
  0x25   :  { %v151_v1 = vld [vmem:[#allocation11 + $0x18] sm:$0xff]  ;;  %208 = vmatpush.msra.mxu1 %v189_v0  ;;  %v150_v3 = vld [vmem:[#allocation11 + $0x10] sm:$0xff]  ;;  %v187_v4 = vld [vmem:[#allocation13 + $0x8] sm:$0xff]  ;;  %905 = vmatpush.msra.mxu2 %v189_v0  ;;  %s1184_s7 = smov 112   ;;  %s1185_s18 = smov 120   ;;  %vm392_vm4 = vcmask 130112  }
  0x26   :  { %171 = vmatpush.msra.mxu0 %v151_v1  ;;  %v149_v5 = vld [vmem:[#allocation11 + $0x8] sm:$0xff]  ;;  %v186_v6 = vld [vmem:[#allocation13] sm:$0xff]  ;;  %v146_v9 = vld [vmem:[#allocation5] sm:$0xff]  ;;  %s1186_s19 = smov 104   ;;  %s256_s20 = sld [smem:[#allocation4]]  ;;  %v255_v25 = vand.u32 127, %v254_v24 }
  0x27   :  { %209 = vmatpush.msra.mxu1 %v188_v2  ;;  %v148_v7 = vld [vmem:[#allocation11] sm:$0xff]  ;;  %906 = vmatpush.msra.mxu2 %v188_v2  ;;  %v185_v10 = vld [vmem:[#allocation8 + $0x8] sm:$0xff]  ;;  %v224_v11 = vld [vmem:[#allocation14 + $0x18] sm:$0xff]  ;;  %v1187_v29 = vmov -1000000.0   ;;  %s890_s21 = sld [smem:[#allocation4 + $0x1]] }
  0x28   :  { %172 = vmatpush.msra.mxu0 %v150_v3  ;;  %v184_v8 = vld [vmem:[#allocation8] sm:$0xff]  ;;  %v223_v12 = vld [vmem:[#allocation14 + $0x10] sm:$0xff]  ;;  %v222_v13 = vld [vmem:[#allocation14 + $0x8] sm:$0xff]  ;;  %s1188_s2 = smov 16   ;;  %s1189_s4 = smov 24   ;;  %vm463_vm5 = vcmask 195712  }
  0x29   :  { %210 = vmatpush.msra.mxu1 %v187_v4  ;;  %907 = vmatpush.msra.mxu2 %v187_v4  ;;  %v221_v14 = vld [vmem:[#allocation14] sm:$0xff]  ;;  %v219_v15 = vld [vmem:[#allocation10] sm:$0xff]  ;;  %v147_v16 = vld [vmem:[#allocation5 + $0x8] sm:$0xff]  ;;  %vm534_vm6 = vcmask 261312   ;;  %s1190_s22 = smov [#allocation17]   ;;  %s856_s26 = sshll.u32 %s1391_s8, 4  ;;  %s857_s26 = int_to_ptr.hbm [resolvable:$true] %s856_s26 }
  0x2a   :  { %173 = vmatpush.msra.mxu0 %v149_v5  ;;  %s854_s23 = sshll.u32 %s1190_s22, 4  ;;  %s855_s23 = int_to_ptr.vmem [resolvable:$true] %s854_s23 }
  0x2b   :  { %211 = vmatpush.msra.mxu1 %v186_v6  ;;  %908 = vmatpush.msra.mxu2 %v186_v6 }
  0x2c   :  { %174 = vmatpush.msra.mxu0 %v148_v7  ;;  %874 = vmatmul.msk.f32.vlgmr.msra.gmra.mxu1 %vm152_vm0, %v184_v8  ;;  %v257_v26 = vstv %s256_s20 }
  0x2d   :  { %872 = vmatmul.msk.f32.vlgmr.msra.gmra.mxu0 %vm152_vm0, %v146_v9  ;;  %875 = vmatmul.msk.f32.vlgmr.msra.gmra.mxu2 %vm152_vm0, %v185_v10  ;;  %vm258_vm2 = vcmp.lt.s32.totalorder %v255_v25, %v257_v26  ;;  %v538_v51 = vstv %s890_s21 }
  0x2e   :  { %243 = vmatpush.msrb.mxu2 %v224_v11  ;;  %v1303_v30 = vsel %vm258_vm2, 0.0, %v1187_v29  ;;  %vm539_vm3 = vcmp.lt.s32.totalorder %v255_v25, %v538_v51 }
  0x2f   :  { %v540_v54 = vsel %vm539_vm3, 0.0, %v1187_v29 }
  0x30   :  { %244 = vmatpush.msrb.mxu2 %v223_v12  ;;  %v220_v12 = vld [vmem:[#allocation10 + $0x8] sm:$0xff] }
  0x32   :  { %245 = vmatpush.msrb.mxu2 %v222_v13 }
  0x34   :  { %246 = vmatpush.msrb.mxu2 %v221_v14 }
  0x35   :  { %876 = vmatmul.msk.f32.vlgmr.msrb.gmra.mxu2 %vm152_vm0, %v219_v15  ;;  %873 = vmatmul.msk.f32.gmra.mxu0 %vm152_vm0, %v147_v16 }
  0x3d   :  { %877 = vmatmul.msk.f32.gmra.mxu2 %vm152_vm0, %v220_v12 }
  0xa9   :  { %v213_v17 = vpop.f32.mrf.mxu1 }
  0xaa   :  { %v176_v18 = vpop.f32.mrf.mxu0  ;;  %396 = vrot.lane.b32.xlu2 %v213_v17, %s1184_s7  ;;  %324 = vrot.lane.b32.xlu1 %v213_v17, %s1185_s18 }
  0xab   :  { %v182_v19 = vmul.f32 0.35355338, %v176_v18  ;;  %878 = vmatpush.xpose.msk.msra.mxu3 %vm260_vm1, %v213_v17 }
  0xae   :  { %879 = vmatmul.msk.f32.vlgmr.msra.gmra.mxu3 %vm260_vm1, %v182_v19 }
  0xb0   :  { %v216_v20 = vpop.f32.mrf.mxu2 }
  0xb2   :  { %467 = vrot.lane.b32.xlu2 %v213_v17, %s1186_s19  ;;  %322 = vrot.lane.b32.xlu1 %v182_v19, %s1185_s18  ;;  %v179_v27 = vpop.f32.mrf.mxu0 }
  0xb3   :  { %v183_v28 = vmul.f32 0.35355338, %v179_v27 }
  0xb8   :  { %v1294_v21 = vpop.f32.mrf.mxu2 }
  0xb9   :  { %316 = vmatpush.msrb.mxu3 %v1294_v21 }
  0xba   :  { %465 = vrot.lane.b32.xlu1 %v182_v19, %s1186_s19  ;;  %604 = vrot.lane.b32.xlu2 %v216_v20, %s1185_s18 }
  0xc2   :  { %675 = vrot.lane.b32.xlu2 %v216_v20, %s1184_s7  ;;  %602 = vrot.lane.b32.xlu1 %v183_v28, %s1185_s18 }
  0xca   :  { %673 = vrot.lane.b32.xlu2 %v183_v28, %s1184_s7  ;;  %745 = vrot.lane.b32.xlu1 %v216_v20, %s1186_s19 }
 0x104   :  { %v397_v22 = vpop.permute.xlu2 %396 }
 0x105   :  { %884 = vmatpush.xpose.msk.msrb.mxu1 %vm260_vm1, %v397_v22 }
 0x109   :  { %891 = vmatpush.xpose.msk.msra.mxu1 %vm260_vm1, %v216_v20 }
 0x10c   :  { %v468_v36 = vpop.permute.xlu2 %467 }
 0x114   :  { %v605_v38 = vpop.permute.xlu2 %604 }
 0x11c   :  { %v325_v23 = vpop.permute.xlu1 %324  ;;  %v676_v42 = vpop.permute.xlu2 %675 }
 0x11d   :  { %881 = vmatpush.xpose.msk.msra.mxu3 %vm260_vm1, %v325_v23 }
 0x124   :  { %v674_v43 = vpop.permute.xlu2 %673  ;;  %v323_v44 = vpop.permute.xlu1 %322 }
 0x12c   :  { %v466_v46 = vpop.permute.xlu1 %465 }
 0x131   :  { %v284_v31 = vpop.f32.mrf.mxu3 }
 0x132   :  { %v285_v32 = vadd.f32 %v284_v31, %v1303_v30 }
 0x134   :  { %v287_v33 = vsel %vm260_vm1, %v285_v32, -inf  ;;  %v603_v49 = vpop.permute.xlu1 %602 }
 0x135   :  { %288 = vmax.xlane.f32.xlu0 %v287_v33 }
 0x13c   :  { %v746_v55 = vpop.permute.xlu1 %745 }
 0x149   :  { %394 = vrot.lane.b32.xlu0 %v182_v19, %s1184_s7 }
 0x1a8   :  { %v289_v34 = vpop.xlane.xlu0 %288 }
 0x1a9   :  { %v290_v35 = vsub.f32 %v285_v32, %v289_v34 }
 0x1ab   :  { %v291_v37 = vmul.f32 1.442695, %v290_v35 }
 0x1ad   :  { %926 = vpow2.f32 %v291_v37 }
 0x1b3   :  { %v927_v39 = vpop.eup %926 }
 0x1b4   :  { %v293_v40 = vsel %vm260_vm1, %v927_v39, 0.0 }
 0x1b5   :  { %294 = vadd.xlane.f32.xlu0 %v293_v40 }
 0x1bb   :  { %v395_v41 = vpop.permute.xlu0 %394 }
 0x1bc   :  { %885 = vmatmul.msk.f32.vlgmr.msrb.gmra.mxu1 %vm260_vm1, %v395_v41  ;;  %v251_v41 = vpop.f32.mrf.mxu2 }
 0x1bd   :  { %897 = vmatpush.xpose.msk.msrb.mxu1 %vm260_vm1, %v676_v42 }
 0x1c4   :  { %892 = vmatmul.msk.f32.vlgmr.msra.gmra.mxu1 %vm260_vm1, %v183_v28 }
 0x1c9   :  { %743 = vrot.lane.b32.xlu0 %v183_v28, %s1186_s19 }
 0x1cc   :  { %898 = vmatmul.msk.f32.vlgmr.msrb.gmra.mxu1 %vm260_vm1, %v674_v43 }
 0x228   :  { %v295_v45 = vpop.xlane.xlu0 %294 }
 0x229   :  { %928 = vrcp.f32 %v295_v45 }
 0x22f   :  { %v929_v47 = vpop.eup %928 }
 0x230   :  { %v297_v48 = vmul.f32 %v929_v47, %v927_v39 }
 0x232   :  { %880 = vmatmul.msk.f32.vlgmr.msrb.gmra.mxu3 %vm260_vm1, %v297_v48 }
 0x233   :  { %887 = vmatpush.xpose.msk.msrb.mxu3 %vm260_vm1, %v468_v36 }
 0x239   :  { %v419_v50 = vpop.f32.mrf.mxu1 }
 0x23a   :  { %v420_v52 = vadd.f32 %v419_v50, %v1303_v30  ;;  %882 = vmatmul.msk.f32.vlgmr.msra.gmra.mxu3 %vm260_vm1, %v323_v44 }
 0x23b   :  { %894 = vmatpush.xpose.msk.msra.mxu3 %vm260_vm1, %v605_v38  ;;  %v744_v62 = vpop.permute.xlu0 %743 }
 0x23c   :  { %v422_v53 = vsel %vm260_vm1, %v420_v52, -inf }
 0x23d   :  { %423 = vmax.xlane.f32.xlu2 %v422_v53 }
 0x241   :  { %v564_v56 = vpop.f32.mrf.mxu1 }
 0x242   :  { %v565_v57 = vadd.f32 %v564_v56, %v540_v54  ;;  %888 = vmatmul.msk.f32.vlgmr.msrb.gmra.mxu3 %vm260_vm1, %v466_v46 }
 0x243   :  { %900 = vmatpush.xpose.msk.msrb.mxu3 %vm260_vm1, %v746_v55 }
 0x244   :  { %v567_v58 = vsel %vm260_vm1, %v565_v57, -inf }
 0x245   :  { %568 = vmax.xlane.f32.xlu2 %v567_v58 }
 0x249   :  { %v698_v59 = vpop.f32.mrf.mxu1 }
 0x24a   :  { %v1324_v60 = vadd.f32 %v698_v59, %v540_v54  ;;  %895 = vmatmul.msk.f32.vlgmr.msra.gmra.mxu3 %vm260_vm1, %v603_v49 }
 0x24c   :  { %v701_v61 = vsel %vm260_vm1, %v1324_v60, -inf }
 0x24d   :  { %702 = vmax.xlane.f32.xlu0 %v701_v61 }
 0x252   :  { %901 = vmatmul.msk.f32.vlgmr.msrb.gmra.mxu3 %vm260_vm1, %v744_v62 }
 0x2b0   :  { %v424_v63 = vpop.xlane.xlu2 %423 }
 0x2b1   :  { %v425_v0 = vsub.f32 %v420_v52, %v424_v63 }
 0x2b3   :  { %v426_v1 = vmul.f32 1.442695, %v425_v0 }
 0x2b5   :  { %930 = vpow2.f32 %v426_v1  ;;  %v318_v2 = vpop.f32.mrf.mxu3 }
 0x2b6   :  { %321 = vst.msk [vmem:[#allocation2] sm:$0xff] %vm260_vm1, %v318_v2 }
 0x2b8   :  { %v569_v4 = vpop.xlane.xlu2 %568 }
 0x2b9   :  { %v570_v8 = vsub.f32 %v565_v57, %v569_v4 }
 0x2bb   :  { %v1331_v3 = vpop.eup %930  ;;  %v571_v10 = vmul.f32 1.442695, %v570_v8 }
 0x2bc   :  { %v428_v5 = vsel %vm260_vm1, %v1331_v3, 0.0 }
 0x2bd   :  { %v347_v6 = vpop.f32.mrf.mxu3  ;;  %429 = vadd.xlane.f32.xlu0 %v428_v5  ;;  %932 = vpow2.f32 %v571_v10 }
 0x2be   :  { %v348_v7 = vadd.f32 %v347_v6, %v1303_v30 }
 0x2c0   :  { %v350_v9 = vsel %vm260_vm1, %v348_v7, -inf  ;;  %v703_v24 = vpop.xlane.xlu0 %702 }
 0x2c1   :  { %351 = vmax.xlane.f32.xlu1 %v350_v9  ;;  %v704_v42 = vsub.f32 %v1324_v60, %v703_v24 }
 0x2c3   :  { %v1340_v15 = vpop.eup %932  ;;  %v705_v44 = vmul.f32 1.442695, %v704_v42 }
 0x2c4   :  { %v573_v19 = vsel %vm260_vm1, %v1340_v15, 0.0 }
 0x2c5   :  { %v490_v11 = vpop.f32.mrf.mxu3 }
 0x2c6   :  { %v491_v13 = vadd.f32 %v490_v11, %v1303_v30 }
 0x2c8   :  { %v493_v14 = vsel %vm260_vm1, %v491_v13, -inf }
 0x2c9   :  { %494 = vmax.xlane.f32.xlu0 %v493_v14 }
 0x2cd   :  { %v627_v16 = vpop.f32.mrf.mxu3 }
 0x2ce   :  { %v628_v17 = vadd.f32 %v627_v16, %v540_v54 }
 0x2d0   :  { %v630_v18 = vsel %vm260_vm1, %v628_v17, -inf }
 0x2d1   :  { %631 = vmax.xlane.f32.xlu1 %v630_v18  ;;  %574 = vadd.xlane.f32.xlu0 %v573_v19  ;;  %v818_v19 = vld [vmem:[#allocation16 + $0x18] sm:$0xff] }
 0x2d2   :  { %837 = vmatpush.msra.mxu1 %v818_v19 }
 0x2d5   :  { %v768_v20 = vpop.f32.mrf.mxu3 }
 0x2d6   :  { %v769_v22 = vadd.f32 %v768_v20, %v540_v54  ;;  %v817_v20 = vld [vmem:[#allocation16 + $0x10] sm:$0xff] }
 0x2d7   :  { %838 = vmatpush.msra.mxu1 %v817_v20 }
 0x2d8   :  { %v771_v23 = vsel %vm260_vm1, %v769_v22, -inf }
 0x2d9   :  { %772 = vmax.xlane.f32.xlu2 %v771_v23  ;;  %v815_v23 = vld [vmem:[#allocation16] sm:$0xff] }
 0x2e5   :  { %504 = vrot.lane.b32.xlu0 %v1294_v21, %s1186_s19 }
 0x330   :  { %v430_v25 = vpop.xlane.xlu0 %429 }
 0x334   :  { %v352_v26 = vpop.xlane.xlu1 %351 }
 0x335   :  { %v353_v27 = vsub.f32 %v348_v7, %v352_v26 }
 0x337   :  { %v354_v28 = vmul.f32 1.442695, %v353_v27 }
 0x339   :  { %934 = vpow2.f32 %v354_v28 }
 0x33c   :  { %v495_v29 = vpop.xlane.xlu0 %494 }
 0x33d   :  { %v496_v30 = vsub.f32 %v491_v13, %v495_v29 }
 0x33f   :  { %v935_v31 = vpop.eup %934  ;;  %v497_v32 = vmul.f32 1.442695, %v496_v30 }
 0x340   :  { %v356_v33 = vsel %vm260_vm1, %v935_v31, 0.0 }
 0x341   :  { %936 = vpow2.f32 %v497_v32  ;;  %357 = vadd.xlane.f32.xlu1 %v356_v33 }
 0x344   :  { %v632_v34 = vpop.xlane.xlu1 %631  ;;  %v575_v51 = vpop.xlane.xlu0 %574 }
 0x345   :  { %v633_v35 = vsub.f32 %v628_v17, %v632_v34 }
 0x347   :  { %v937_v36 = vpop.eup %936  ;;  %v634_v37 = vmul.f32 1.442695, %v633_v35 }
 0x348   :  { %v499_v38 = vsel %vm260_vm1, %v937_v36, 0.0 }
 0x349   :  { %938 = vpow2.f32 %v634_v37  ;;  %500 = vadd.xlane.f32.xlu2 %v499_v38 }
 0x34a   :  { %940 = vpow2.f32 %v705_v44 }
 0x34c   :  { %v773_v43 = vpop.xlane.xlu2 %772 }
 0x34d   :  { %v774_v45 = vsub.f32 %v769_v22, %v773_v43  ;;  %v816_v22 = vld [vmem:[#allocation16 + $0x8] sm:$0xff] }
 0x34e   :  { %839 = vmatpush.msra.mxu1 %v816_v22 }
 0x34f   :  { %v939_v39 = vpop.eup %938  ;;  %v775_v46 = vmul.f32 1.442695, %v774_v45 }
 0x350   :  { %v636_v40 = vsel %vm260_vm1, %v939_v39, 0.0  ;;  %v941_v47 = vpop.eup %940  ;;  %840 = vmatpush.msra.mxu1 %v815_v23 }
 0x351   :  { %637 = vadd.xlane.f32.xlu0 %v636_v40  ;;  %942 = vpow2.f32 %v775_v46  ;;  %v707_v48 = vsel %vm260_vm1, %v941_v47, 0.0 }
 0x352   :  { %944 = vrcp.f32 %v430_v25 }
 0x353   :  { %946 = vrcp.f32 %v575_v51 }
 0x357   :  { %v505_v56 = vpop.permute.xlu0 %504 }
 0x35a   :  { %362 = vrot.lane.b32.xlu1 %v1294_v21, %s1185_s18 }
 0x361   :  { %433 = vrot.lane.b32.xlu2 %v1294_v21, %s1184_s7  ;;  %v943_v21 = vpop.eup %942 }
 0x362   :  { %v777_v49 = vsel %vm260_vm1, %v943_v21, 0.0  ;;  %v945_v53 = vpop.eup %944 }
 0x363   :  { %v432_v54 = vmul.f32 %v945_v53, %v1331_v3  ;;  %v947_v57 = vpop.eup %946 }
 0x364   :  { %v577_v59 = vmul.f32 %v947_v57, %v1340_v15 }
 0x365   :  { %642 = vrot.lane.b32.xlu0 %v251_v41, %s1185_s18 }
 0x36d   :  { %712 = vrot.lane.b32.xlu0 %v251_v41, %s1184_s7 }
 0x375   :  { %782 = vrot.lane.b32.xlu0 %v251_v41, %s1186_s19 }
 0x384   :  { %708 = vadd.xlane.f32.xlu1 %v707_v48 }
 0x38a   :  { %778 = vadd.xlane.f32.xlu2 %v777_v49 }
 0x3b4   :  { %v358_v52 = vpop.xlane.xlu1 %357 }
 0x3b5   :  { %948 = vrcp.f32 %v358_v52 }
 0x3bb   :  { %v949_v58 = vpop.eup %948 }
 0x3bc   :  { %v501_v50 = vpop.xlane.xlu2 %500  ;;  %v360_v61 = vmul.f32 %v949_v58, %v935_v31 }
 0x3bd   :  { %950 = vrcp.f32 %v501_v50 }
 0x3c3   :  { %v951_v63 = vpop.eup %950 }
 0x3c4   :  { %v434_v55 = vpop.permute.xlu2 %433  ;;  %v638_v62 = vpop.xlane.xlu0 %637  ;;  %v503_v0 = vmul.f32 %v951_v63, %v937_v36 }
 0x3c5   :  { %454 = vmatpush.msra.mxu2 %v434_v55  ;;  %952 = vrcp.f32 %v638_v62 }
 0x3c6   :  { %886 = vmatmul.msk.f32.vlgmr.msra.gmra.mxu2 %vm260_vm1, %v432_v54 }
 0x3c7   :  { %596 = vmatpush.msrb.mxu2 %v251_v41 }
 0x3cb   :  { %v953_v2 = vpop.eup %952 }
 0x3cc   :  { %v363_v60 = vpop.permute.xlu1 %362  ;;  %v640_v3 = vmul.f32 %v953_v2, %v939_v39 }
 0x3cd   :  { %383 = vmatpush.msrb.mxu0 %v363_v60 }
 0x3ce   :  { %883 = vmatmul.msk.f32.vlgmr.msrb.gmra.mxu0 %vm260_vm1, %v360_v61  ;;  %893 = vmatmul.msk.f32.vlgmr.msrb.gmra.mxu2 %vm260_vm1, %v577_v59 }
 0x3cf   :  { %525 = vmatpush.msra.mxu0 %v505_v56 }
 0x3d6   :  { %889 = vmatmul.msk.f32.vlgmr.msra.gmra.mxu0 %vm260_vm1, %v503_v0 }
 0x3d7   :  { %v643_v1 = vpop.permute.xlu0 %642 }
 0x3d8   :  { %663 = vmatpush.msrb.mxu0 %v643_v1 }
 0x3de   :  { %896 = vmatmul.msk.f32.vlgmr.msrb.gmra.mxu0 %vm260_vm1, %v640_v3 }
 0x3df   :  { %v713_v4 = vpop.permute.xlu0 %712 }
 0x3e0   :  { %733 = vmatpush.msra.mxu2 %v713_v4 }
 0x3e7   :  { %v783_v5 = vpop.permute.xlu0 %782 }
 0x3e8   :  { %803 = vmatpush.msra.mxu0 %v783_v5 }
 0x3f7   :  { %v709_v6 = vpop.xlane.xlu1 %708 }
 0x3f8   :  { %954 = vrcp.f32 %v709_v6 }
 0x3fd   :  { %v779_v7 = vpop.xlane.xlu2 %778 }
 0x3fe   :  { %v955_v8 = vpop.eup %954  ;;  %956 = vrcp.f32 %v779_v7 }
 0x3ff   :  { %v711_v9 = vmul.f32 %v955_v8, %v941_v47 }
 0x401   :  { %899 = vmatmul.msk.f32.vlgmr.msra.gmra.mxu2 %vm260_vm1, %v711_v9 }
 0x404   :  { %v957_v10 = vpop.eup %956 }
 0x405   :  { %v781_v11 = vmul.f32 %v957_v10, %v943_v21 }
 0x407   :  { %902 = vmatmul.msk.f32.vlgmr.msra.gmra.mxu0 %vm260_vm1, %v781_v11 }
 0x449   :  { %v456_v12 = vpop.f32.mrf.mxu2 }
 0x44a   :  { %460 = vrot.lane.b32.xlu1 %v456_v12, %s1188_s2 }
 0x44b   :  { %v385_v13 = vpop.f32.mrf.mxu0 }
 0x44c   :  { %389 = vrot.lane.b32.xlu0 %v385_v13, %s1177_s17 }
 0x451   :  { %v598_v14 = vpop.f32.mrf.mxu2 }
 0x452   :  { %601 = vst.msk [vmem:[#allocation2 + $0x8] sm:$0xff] %vm260_vm1, %v598_v14 }
 0x453   :  { %v527_v15 = vpop.f32.mrf.mxu0 }
 0x454   :  { %531 = vrot.lane.b32.xlu0 %v527_v15, %s1189_s4 }
 0x45b   :  { %v665_v16 = vpop.f32.mrf.mxu0 }
 0x45c   :  { %669 = vrot.lane.b32.xlu2 %v665_v16, %s1177_s17 }
 0x484   :  { %v735_v17 = vpop.f32.mrf.mxu2  ;;  %v805_v18 = vpop.f32.mrf.mxu0 }
 0x485   :  { %739 = vrot.lane.b32.xlu0 %v735_v17, %s1188_s2 }
 0x48d   :  { %809 = vrot.lane.b32.xlu0 %v805_v18, %s1189_s4 }
 0x4b6   :  { %v670_v24 = vpop.permute.xlu2 %669 }
 0x4b7   :  { %672 = vst.msk [vmem:[#allocation2 + $0x8] sm:$0xff] %vm392_vm4, %v670_v24 }
 0x4bc   :  { %v461_v26 = vpop.permute.xlu1 %460 }
 0x4be   :  { %v390_v25 = vpop.permute.xlu0 %389 }
 0x4bf   :  { %393 = vst.msk [vmem:[#allocation2] sm:$0xff] %vm392_vm4, %v390_v25 }
 0x4c0   :  { %464 = vst.msk [vmem:[#allocation2] sm:$0xff] %vm463_vm5, %v461_v26 }
 0x4c6   :  { %v532_v27 = vpop.permute.xlu0 %531 }
 0x4c7   :  { %535 = vst.msk [vmem:[#allocation2] sm:$0xff] %vm534_vm6, %v532_v27 }
 0x4ce   :  { %v813_v28 = vld [vmem:[#allocation2] sm:$0xff] }
 0x4cf   :  { %903 = vmatmul.msk.f32.vlgmr.msra.gmra.mxu1 %vm152_vm0, %v813_v28 }
 0x4f7   :  { %v740_v29 = vpop.permute.xlu0 %739 }
 0x4f8   :  { %742 = vst.msk [vmem:[#allocation2 + $0x8] sm:$0xff] %vm463_vm5, %v740_v29 }
 0x4ff   :  { %v810_v30 = vpop.permute.xlu0 %809 }
 0x500   :  { %812 = vst.msk [vmem:[#allocation2 + $0x8] sm:$0xff] %vm534_vm6, %v810_v30 }
 0x507   :  { %v814_v31 = vld [vmem:[#allocation2 + $0x8] sm:$0xff] }
 0x508   :  { %904 = vmatmul.msk.f32.gmra.mxu1 %vm152_vm0, %v814_v31 }
 0x54c   :  { %v842_v32 = vpop.f32.mrf.mxu1 }
 0x54d   :  { %848 = vst.msk [vmem:[#allocation17] sm:$0xff] %vm152_vm0, %v842_v32 }
 0x585   :  { %v845_v33 = vpop.f32.mrf.mxu1 }
 0x586   :  { %849 = vst.msk [vmem:[#allocation17 + $0x8] sm:$0xff] %vm152_vm0, %v845_v33 }
 0x587   :  { %862 = dma.vmem_to_hbm [thread:$0]  %s855_s23, 256, %s857_s26, [#allocation7], %s1176_s16, %s1176_s16, %s1177_s17  }
 0x588   :  { %1172 = dma.done.wait [#allocation7], 256  }
 0x589   :  { %1173 = vsyncadd [#allocation7], 4294967040 }
 0x58a   :  { %867 = vsyncpa [#allocation6], 1 }
 0x58b   :  { %868 = vsyncpa [#allocation9], 1 }
 0x58c   :  { %869 = vsyncpa [#allocation12], 1 }
 0x58d   :  { %870 = vsyncpa [#allocation15], 1 }
 0x58e   :  { %871 = vsyncpa [#allocation7], 1 }

</bundles_post_ra>
